<compile_context>
chip_gen: v6e
topology: v6e:2x2x1
jax: 0.10.0
libtpu: 0.0.40
codegen_flags: <defaults>
</compile_context>

<pallas_src>
import jax
import jax.numpy as jnp
from jax.experimental import pallas as pl
from jax.experimental.pallas import tpu as pltpu

INPUT_DIM = 8
TRUNK_DIMS = (32, 32)            # trunk_hidden_dims
HEAD_HIDDEN = 16                 # head_hidden_dims = [16]
NUM_TASKS = 4                    # ['fugacity', 'mu', 'activity', 'xgas']
HEAD_CAT = NUM_TASKS * HEAD_HIDDEN   # 64


def multitask_kernel(x_ref, tw0_ref, tb0_ref, tw1_ref, tb1_ref,
                     hw1_ref, hb1_ref, hw2_ref, hb2_ref, out_ref):
    # ---- shared trunk: (Linear -> ReLU) x 2 ----
    h = x_ref[...]
    h = jnp.maximum(
        jnp.dot(h, tw0_ref[...], preferred_element_type=jnp.float32) + tb0_ref[...], 0.0)
    h = jnp.maximum(
        jnp.dot(h, tw1_ref[...], preferred_element_type=jnp.float32) + tb1_ref[...], 0.0)

    # ---- all 4 heads fused: one (32,64) matmul + ReLU, then one block-diagonal
    #      (64,4) matmul whose 4 lanes are the per-task outputs ----
    g = jnp.maximum(
        jnp.dot(h, hw1_ref[...], preferred_element_type=jnp.float32) + hb1_ref[...], 0.0)
    out_ref[...] = jnp.dot(g, hw2_ref[...], preferred_element_type=jnp.float32) + hb2_ref[...]


def _choose_tile(batch):
    """One tile for small/medium batches (per-step overhead dominates on single-TC
    chips); 2048-row tiles for large batches so v7x megacore gets >= 2 steps/core."""
    if batch <= 4096:
        return batch
    return 2048


def multitask_forward(x, packed, *, tb=None):
    tw0, tb0, tw1, tb1, hw1, hb1, hw2, hb2 = packed
    weights = (tw0, tb0, tw1, tb1, hw1, hb1, hw2, hb2)
    B, din = x.shape
    if tb is None:
        tb = _choose_tile(B)

    # Memory-bound cost hint: traffic is dominated by the (narrow) activations/outputs.
    w_bytes = sum(int(a.size) * 4 for a in weights)
    cost = pl.CostEstimate(
        flops=2 * B * (din * TRUNK_DIMS[0] + TRUNK_DIMS[0] * TRUNK_DIMS[1]
                       + TRUNK_DIMS[1] * HEAD_CAT + HEAD_CAT * NUM_TASKS),
        transcendentals=0,
        bytes_accessed=B * (din + NUM_TASKS) * 4 + w_bytes,
    )

    def wspec(a):
        # full-extent block, constant index map -> same weight tile every grid step
        return pl.BlockSpec(a.shape, lambda i: (0, 0))

    out = pl.pallas_call(
        multitask_kernel,
        out_shape=jax.ShapeDtypeStruct((B, NUM_TASKS), jnp.float32),
        grid_spec=pltpu.PrefetchScalarGridSpec(
            num_scalar_prefetch=0,
            grid=(pl.cdiv(B, tb),),                      # ragged last block is clipped
            in_specs=[pl.BlockSpec((tb, din), lambda i: (i, 0))]
                     + [wspec(a) for a in weights],
            out_specs=pl.BlockSpec((tb, NUM_TASKS), lambda i: (i, 0)),
        ),
        compiler_params=pltpu.CompilerParams(dimension_semantics=("parallel",)),
        cost_estimate=cost,
    )(x, *weights)

    return out


# ----------------------------- parameter handling -----------------------------

def init_params(key):
    """Deterministic PyTorch-Linear-style init (uniform +/- 1/sqrt(fan_in)), unfused form."""
    ks = jax.random.split(key, 2 + 2 * NUM_TASKS)

    def lin(k, fin, fout):
        kw, kb = jax.random.split(k)
        bound = 1.0 / jnp.sqrt(jnp.float32(fin))
        w = jax.random.uniform(kw, (fin, fout), jnp.float32, -bound, bound)
        b = jax.random.uniform(kb, (fout,), jnp.float32, -bound, bound)
        return w, b

    tw0, tb0 = lin(ks[0], INPUT_DIM, TRUNK_DIMS[0])
    tw1, tb1 = lin(ks[1], TRUNK_DIMS[0], TRUNK_DIMS[1])
    heads = []
    for t in range(NUM_TASKS):
        w1, b1 = lin(ks[2 + 2 * t], TRUNK_DIMS[1], HEAD_HIDDEN)
        w2, b2 = lin(ks[3 + 2 * t], HEAD_HIDDEN, 1)
        heads.append((w1, b1, w2, b2))
    return (tw0, tb0), (tw1, tb1), heads


def pack_params(raw):
    """Host-side, one-time packing of the 4 heads into fused weight matrices."""
    (tw0, tb0), (tw1, tb1), heads = raw
    hw1 = jnp.concatenate([w1 for (w1, _, _, _) in heads], axis=1)           # (32, 64)
    hb1 = jnp.concatenate([b1 for (_, b1, _, _) in heads]).reshape(1, HEAD_CAT)
    hw2 = jnp.zeros((HEAD_CAT, NUM_TASKS), jnp.float32)                      # block-diagonal
    hb2 = jnp.zeros((1, NUM_TASKS), jnp.float32)
    for t, (_, _, w2, b2) in enumerate(heads):
        hw2 = hw2.at[t * HEAD_HIDDEN:(t + 1) * HEAD_HIDDEN, t].set(w2[:, 0])
        hb2 = hb2.at[0, t].set(b2[0])
    return (tw0, tb0.reshape(1, -1), tw1, tb1.reshape(1, -1), hw1, hb1, hw2, hb2)


def reference_forward(x, raw):
    (tw0, tb0), (tw1, tb1), heads = raw
    h = jnp.maximum(x @ tw0 + tb0, 0.0)
    h = jnp.maximum(h @ tw1 + tb1, 0.0)
    outs = []
    for (w1, b1, w2, b2) in heads:
        g = jnp.maximum(h @ w1 + b1, 0.0)
        outs.append(g @ w2 + b2)
    return jnp.concatenate(outs, axis=1)


if __name__ == "__main__":
    key = jax.random.PRNGKey(0)
    kx, kp = jax.random.split(key)

    B = 16
    x = jax.random.normal(kx, (B, INPUT_DIM), dtype=jnp.float32)
    raw = init_params(kp)
    packed = pack_params(raw)

    out = jax.block_until_ready(multitask_forward(x, packed))

    ref = reference_forward(x, raw)
    assert out.shape == (B, NUM_TASKS)
    assert jnp.allclose(out, ref, atol=1e-5, rtol=1e-5), "mismatch vs JAX reference"

    print("KERNEL_OK")
</pallas_src>

<mosaic_0001>
module attributes {stable_mosaic.version = 11 : i64} {
  func.func @multitask_kernel(%arg0: i32, %arg1: memref<16x8xf32, #tpu.memory_space<vmem>>, %arg2: memref<8x32xf32, #tpu.memory_space<vmem>>, %arg3: memref<1x32xf32, #tpu.memory_space<vmem>>, %arg4: memref<32x32xf32, #tpu.memory_space<vmem>>, %arg5: memref<1x32xf32, #tpu.memory_space<vmem>>, %arg6: memref<32x64xf32, #tpu.memory_space<vmem>>, %arg7: memref<1x64xf32, #tpu.memory_space<vmem>>, %arg8: memref<64x4xf32, #tpu.memory_space<vmem>>, %arg9: memref<1x4xf32, #tpu.memory_space<vmem>>, %arg10: memref<16x4xf32, #tpu.memory_space<vmem>>) attributes {dimension_semantics = [#tpu.dimension_semantics<parallel>], iteration_bounds = array<i64: 1>, scalar_prefetch = 0 : i64, scratch_operands = 0 : i64, tpu.core_type = #tpu.core_type<tc>, window_params = [{transform_indices = @transform_0, window_bounds = array<i64: 16, 8>}, {pipeline_mode = #tpu.pipeline_mode<synchronous>, transform_indices = @transform_1, window_bounds = array<i64: 8, 32>}, {pipeline_mode = #tpu.pipeline_mode<synchronous>, transform_indices = @transform_2, window_bounds = array<i64: 1, 32>}, {pipeline_mode = #tpu.pipeline_mode<synchronous>, transform_indices = @transform_3, window_bounds = array<i64: 32, 32>}, {pipeline_mode = #tpu.pipeline_mode<synchronous>, transform_indices = @transform_4, window_bounds = array<i64: 1, 32>}, {pipeline_mode = #tpu.pipeline_mode<synchronous>, transform_indices = @transform_5, window_bounds = array<i64: 32, 64>}, {pipeline_mode = #tpu.pipeline_mode<synchronous>, transform_indices = @transform_6, window_bounds = array<i64: 1, 64>}, {pipeline_mode = #tpu.pipeline_mode<synchronous>, transform_indices = @transform_7, window_bounds = array<i64: 64, 4>}, {pipeline_mode = #tpu.pipeline_mode<synchronous>, transform_indices = @transform_8, window_bounds = array<i64: 1, 4>}, {transform_indices = @transform_9, window_bounds = array<i64: 16, 4>}]} {
    %c0 = arith.constant 0 : index
    %c0_0 = arith.constant 0 : index
    %0 = vector.load %arg1[%c0, %c0_0] : memref<16x8xf32, #tpu.memory_space<vmem>>, vector<16x8xf32>
    %c0_1 = arith.constant 0 : index
    %c0_2 = arith.constant 0 : index
    %1 = vector.load %arg2[%c0_1, %c0_2] : memref<8x32xf32, #tpu.memory_space<vmem>>, vector<8x32xf32>
    %cst = arith.constant dense<0.000000e+00> : vector<16x32xf32>
    %2 = tpu.matmul %0, %1, %cst {dimension_numbers = #tpu.dot_dimension_numbers<[1], [0], [0], [1], [0, 0, 1, 1], [], []>} : vector<16x8xf32>, vector<8x32xf32>, vector<16x32xf32> -> vector<16x32xf32>
    %c0_3 = arith.constant 0 : index
    %c0_4 = arith.constant 0 : index
    %3 = vector.load %arg3[%c0_3, %c0_4] : memref<1x32xf32, #tpu.memory_space<vmem>>, vector<1x32xf32>
    %4 = vector.broadcast %3 : vector<1x32xf32> to vector<16x32xf32>
    %5 = arith.addf %2, %4 : vector<16x32xf32>
    %cst_5 = arith.constant 0.000000e+00 : f32
    %6 = vector.broadcast %cst_5 : f32 to vector<16x32xf32>
    %7 = arith.maximumf %5, %6 : vector<16x32xf32>
    %c0_6 = arith.constant 0 : index
    %c0_7 = arith.constant 0 : index
    %8 = vector.load %arg4[%c0_6, %c0_7] : memref<32x32xf32, #tpu.memory_space<vmem>>, vector<32x32xf32>
    %cst_8 = arith.constant dense<0.000000e+00> : vector<16x32xf32>
    %9 = tpu.matmul %7, %8, %cst_8 {dimension_numbers = #tpu.dot_dimension_numbers<[1], [0], [0], [1], [0, 0, 1, 1], [], []>} : vector<16x32xf32>, vector<32x32xf32>, vector<16x32xf32> -> vector<16x32xf32>
    %c0_9 = arith.constant 0 : index
    %c0_10 = arith.constant 0 : index
    %10 = vector.load %arg5[%c0_9, %c0_10] : memref<1x32xf32, #tpu.memory_space<vmem>>, vector<1x32xf32>
    %11 = vector.broadcast %10 : vector<1x32xf32> to vector<16x32xf32>
    %12 = arith.addf %9, %11 : vector<16x32xf32>
    %cst_11 = arith.constant 0.000000e+00 : f32
    %13 = vector.broadcast %cst_11 : f32 to vector<16x32xf32>
    %14 = arith.maximumf %12, %13 : vector<16x32xf32>
    %c0_12 = arith.constant 0 : index
    %c0_13 = arith.constant 0 : index
    %15 = vector.load %arg6[%c0_12, %c0_13] : memref<32x64xf32, #tpu.memory_space<vmem>>, vector<32x64xf32>
    %cst_14 = arith.constant dense<0.000000e+00> : vector<16x64xf32>
    %16 = tpu.matmul %14, %15, %cst_14 {dimension_numbers = #tpu.dot_dimension_numbers<[1], [0], [0], [1], [0, 0, 1, 1], [], []>} : vector<16x32xf32>, vector<32x64xf32>, vector<16x64xf32> -> vector<16x64xf32>
    %c0_15 = arith.constant 0 : index
    %c0_16 = arith.constant 0 : index
    %17 = vector.load %arg7[%c0_15, %c0_16] : memref<1x64xf32, #tpu.memory_space<vmem>>, vector<1x64xf32>
    %18 = vector.broadcast %17 : vector<1x64xf32> to vector<16x64xf32>
    %19 = arith.addf %16, %18 : vector<16x64xf32>
    %cst_17 = arith.constant 0.000000e+00 : f32
    %20 = vector.broadcast %cst_17 : f32 to vector<16x64xf32>
    %21 = arith.maximumf %19, %20 : vector<16x64xf32>
    %c0_18 = arith.constant 0 : index
    %c0_19 = arith.constant 0 : index
    %22 = vector.load %arg8[%c0_18, %c0_19] : memref<64x4xf32, #tpu.memory_space<vmem>>, vector<64x4xf32>
    %cst_20 = arith.constant dense<0.000000e+00> : vector<16x4xf32>
    %23 = tpu.matmul %21, %22, %cst_20 {dimension_numbers = #tpu.dot_dimension_numbers<[1], [0], [0], [1], [0, 0, 1, 1], [], []>} : vector<16x64xf32>, vector<64x4xf32>, vector<16x4xf32> -> vector<16x4xf32>
    %c0_21 = arith.constant 0 : index
    %c0_22 = arith.constant 0 : index
    %24 = vector.load %arg9[%c0_21, %c0_22] : memref<1x4xf32, #tpu.memory_space<vmem>>, vector<1x4xf32>
    %25 = vector.broadcast %24 : vector<1x4xf32> to vector<16x4xf32>
    %26 = arith.addf %23, %25 : vector<16x4xf32>
    %c0_23 = arith.constant 0 : index
    %c0_24 = arith.constant 0 : index
    %27 = vector.load %arg10[%c0_23, %c0_24] : memref<16x4xf32, #tpu.memory_space<vmem>>, vector<16x4xf32>
    tpu.vector_store %arg10[%c0_23, %c0_24], %26 {strides = array<i32>} : memref<16x4xf32, #tpu.memory_space<vmem>>, vector<16x4xf32>,
    return
  }
  func.func @transform_0(%arg0: i32) -> (i32, i32) {
    %c0_i32 = arith.constant 0 : i32
    %c0_i32_0 = arith.constant 0 : i32
    return %arg0, %c0_i32 : i32, i32
  }
  func.func @transform_1(%arg0: i32) -> (i32, i32) {
    %c0_i32 = arith.constant 0 : i32
    %c0_i32_0 = arith.constant 0 : i32
    %c0_i32_1 = arith.constant 0 : i32
    return %c0_i32, %c0_i32_0 : i32, i32
  }
  func.func @transform_2(%arg0: i32) -> (i32, i32) {
    %c0_i32 = arith.constant 0 : i32
    %c0_i32_0 = arith.constant 0 : i32
    %c0_i32_1 = arith.constant 0 : i32
    return %c0_i32, %c0_i32_0 : i32, i32
  }
  func.func @transform_3(%arg0: i32) -> (i32, i32) {
    %c0_i32 = arith.constant 0 : i32
    %c0_i32_0 = arith.constant 0 : i32
    %c0_i32_1 = arith.constant 0 : i32
    return %c0_i32, %c0_i32_0 : i32, i32
  }
  func.func @transform_4(%arg0: i32) -> (i32, i32) {
    %c0_i32 = arith.constant 0 : i32
    %c0_i32_0 = arith.constant 0 : i32
    %c0_i32_1 = arith.constant 0 : i32
    return %c0_i32, %c0_i32_0 : i32, i32
  }
  func.func @transform_5(%arg0: i32) -> (i32, i32) {
    %c0_i32 = arith.constant 0 : i32
    %c0_i32_0 = arith.constant 0 : i32
    %c0_i32_1 = arith.constant 0 : i32
    return %c0_i32, %c0_i32_0 : i32, i32
  }
  func.func @transform_6(%arg0: i32) -> (i32, i32) {
    %c0_i32 = arith.constant 0 : i32
    %c0_i32_0 = arith.constant 0 : i32
    %c0_i32_1 = arith.constant 0 : i32
    return %c0_i32, %c0_i32_0 : i32, i32
  }
  func.func @transform_7(%arg0: i32) -> (i32, i32) {
    %c0_i32 = arith.constant 0 : i32
    %c0_i32_0 = arith.constant 0 : i32
    %c0_i32_1 = arith.constant 0 : i32
    return %c0_i32, %c0_i32_0 : i32, i32
  }
  func.func @transform_8(%arg0: i32) -> (i32, i32) {
    %c0_i32 = arith.constant 0 : i32
    %c0_i32_0 = arith.constant 0 : i32
    %c0_i32_1 = arith.constant 0 : i32
    return %c0_i32, %c0_i32_0 : i32, i32
  }
  func.func @transform_9(%arg0: i32) -> (i32, i32) {
    %c0_i32 = arith.constant 0 : i32
    %c0_i32_0 = arith.constant 0 : i32
    return %arg0, %c0_i32 : i32, i32
  }
}

</mosaic_0001>

<bundles_post_ra>
// kernel: tpu_custom_call.1
= control target key start
LH: loop header
LB: loop body
LE: loop exit
PB: predicated region body
PF: predicated region fallthrough
CT: control target
= control target key end

     0   :  { %vm42_vm0 = vcmask 64512   ;;  %vm137_vm1 = vcmask 261120   ;;  %vm330_vm2 = vcmask 523264   ;;  %vm412_vm3 = vcmask 31744   ;;  %s631_s1 = inlined_call_operand.vmem [shape: f32[8,32], index: 1, kind: input, shape index: {}]   ;;  %s632_s0 = inlined_call_operand.vmem [shape: f32[16,8], index: 0, kind: input, shape index: {}]   ;;  %s633_s3 = inlined_call_operand.vmem [shape: f32[32,32], index: 3, kind: input, shape index: {}]   ;;  %s634_s2 = inlined_call_operand.vmem [shape: f32[1,32], index: 2, kind: input, shape index: {}]   ;;  %s635_s5 = inlined_call_operand.vmem [shape: f32[32,64], index: 5, kind: input, shape index: {}]   ;;  %s636_s7 = inlined_call_operand.vmem [shape: f32[64,4], index: 7, kind: input, shape index: {}]   ;;  %s637_s4 = inlined_call_operand.vmem [shape: f32[1,32], index: 4, kind: input, shape index: {}]   ;;  %s638_s6 = inlined_call_operand.vmem [shape: f32[1,64], index: 6, kind: input, shape index: {}]   ;;  %s639_s8 = inlined_call_operand.vmem [shape: f32[1,4], index: 8, kind: input, shape index: {}]   ;;  %s640_s9 = inlined_call_operand.vmem [shape: f32[16,4], index: 9, kind: output, shape index: {}]  }
   0x1   :  { %v34_v0 = vld [vmem:[%s631_s1] sm:$0xff]  ;;  %v33_v2 = vld [vmem:[%s632_s0 + $0x8] sm:$0xff]  ;;  %v129_v3 = vld [vmem:[%s633_s3 + $0x18] sm:$0xff] }
   0x2   :  { %v32_v1 = vld [vmem:[%s632_s0] sm:$0xff]  ;;  %456 = vmatprep.subr.mxu0 %v34_v0  ;;  %v128_v4 = vld [vmem:[%s633_s3 + $0x10] sm:$0xff]  ;;  %v127_v5 = vld [vmem:[%s633_s3 + $0x8] sm:$0xff] }
   0x3   :  { %458 = vmatprep.mubr.msk.f32.mxu0 %vm42_vm0, %v32_v1  ;;  %457 = vmatpush3.msra.mxu0 %v34_v0  ;;  %v126_v6 = vld [vmem:[%s633_s3] sm:$0xff]  ;;  %v224_v14 = vld [vmem:[%s635_s5 + $0x18] sm:$0xff]  ;;  %v223_v15 = vld [vmem:[%s635_s5 + $0x10] sm:$0xff] }
   0x4   :  { %459 = vmatmul.mubr.msk.f32.vlgmr.msra.gmra.mxu0 %vm42_vm0, %v33_v2  ;;  %461 = vmatprep.subr.mxu0 %v129_v3  ;;  %v419_v7 = vld [vmem:[%s634_s2] ss:$0 sm:$0xff]  ;;  %v222_v16 = vld [vmem:[%s635_s5 + $0x8] sm:$0xff]  ;;  %v322_v18 = vld [vmem:[%s636_s7 + $0x38] sm:$0xff] }
   0x5   :  { %462 = vmatpush3.msra.mxu0 %v129_v3  ;;  %v221_v17 = vld [vmem:[%s635_s5] sm:$0xff]  ;;  %v321_v19 = vld [vmem:[%s636_s7 + $0x30] sm:$0xff]  ;;  %483 = vmatprep.subr.mxu1 %v322_v18  ;;  %v320_v20 = vld [vmem:[%s636_s7 + $0x28] sm:$0xff] }
   0x6   :  { %463 = vmatprep.subr.mxu0 %v128_v4  ;;  %484 = vmatpush3.msra.mxu1 %v322_v18  ;;  %v319_v21 = vld [vmem:[%s636_s7 + $0x20] sm:$0xff]  ;;  %v318_v29 = vld [vmem:[%s636_s7 + $0x18] sm:$0xff]  ;;  %v317_v30 = vld [vmem:[%s636_s7 + $0x10] sm:$0xff] }
   0x7   :  { %464 = vmatpush3.msra.mxu0 %v128_v4  ;;  %485 = vmatprep.subr.mxu1 %v321_v19  ;;  %v422_v22 = vld [vmem:[%s637_s4] ss:$0 sm:$0xff]  ;;  %v316_v31 = vld [vmem:[%s636_s7 + $0x8] sm:$0xff] }
   0x8   :  { %465 = vmatprep.subr.mxu0 %v127_v5  ;;  %486 = vmatpush3.msra.mxu1 %v321_v19  ;;  %v315_v32 = vld [vmem:[%s636_s7] sm:$0xff] }
   0x9   :  { %466 = vmatpush3.msra.mxu0 %v127_v5  ;;  %487 = vmatprep.subr.mxu1 %v320_v20  ;;  %v425_v33 = vld [vmem:[%s638_s6] ss:$0 sm:$0xff] }
   0xa   :  { %467 = vmatprep.subr.mxu0 %v126_v6  ;;  %488 = vmatpush3.msra.mxu1 %v320_v20  ;;  %v428_v40 = vld [vmem:[%s639_s8] ss:$0 sm:$0xff] }
   0xb   :  { %468 = vmatpush3.msra.mxu0 %v126_v6  ;;  %489 = vmatprep.subr.mxu1 %v319_v21 }
   0xc   :  { %472 = vmatprep.subr.mxu0 %v224_v14  ;;  %490 = vmatpush3.msra.mxu1 %v319_v21 }
   0xd   :  { %491 = vmatprep.subr.mxu1 %v318_v29 }
   0xe   :  { %492 = vmatpush3.msra.mxu1 %v318_v29 }
   0xf   :  { %493 = vmatprep.subr.mxu1 %v317_v30 }
  0x10   :  { %494 = vmatpush3.msra.mxu1 %v317_v30 }
  0x11   :  { %495 = vmatprep.subr.mxu1 %v316_v31 }
  0x12   :  { %496 = vmatpush3.msra.mxu1 %v316_v31 }
  0x13   :  { %497 = vmatprep.subr.mxu1 %v315_v32 }
  0x14   :  { %498 = vmatpush3.msra.mxu1 %v315_v32 }
  0xc4   :  { %v460_v8 = vpop.f32.mrf.mxu0 }
  0xc5   :  { %v121_v9 = vadd.f32 %v460_v8, %v419_v7 }
  0xc6   :  { %v115_v10 = vpop.f32.mrf.mxu0 }
  0xc7   :  { %v116_v11 = vadd.f32 %v419_v7, %v115_v10  ;;  %v125_v13 = vmax.f32 %v121_v9, 0.0 }
  0xc9   :  { %v124_v12 = vmax.f32 %v116_v11, 0.0 }
  0xcb   :  { %469 = vmatprep.mubr.msk.f32.mxu0 %vm137_vm1, %v124_v12 }
  0xcc   :  { %470 = vmatmul.mubr.msk.f32.vlgmr.msra.gmra.mxu0 %vm137_vm1, %v125_v13 }
  0xcd   :  { %473 = vmatpush3.msra.mxu0 %v224_v14 }
  0xce   :  { %474 = vmatprep.subr.mxu0 %v223_v15 }
  0xcf   :  { %475 = vmatpush3.msra.mxu0 %v223_v15 }
  0xd0   :  { %476 = vmatprep.subr.mxu0 %v222_v16 }
  0xd1   :  { %477 = vmatpush3.msra.mxu0 %v222_v16 }
  0xd2   :  { %478 = vmatprep.subr.mxu0 %v221_v17 }
  0xd3   :  { %479 = vmatpush3.msra.mxu0 %v221_v17 }
 0x18c   :  { %v471_v23 = vpop.f32.mrf.mxu0 }
 0x18d   :  { %v216_v24 = vadd.f32 %v471_v23, %v422_v22 }
 0x18e   :  { %v210_v25 = vpop.f32.mrf.mxu0 }
 0x18f   :  { %v211_v26 = vadd.f32 %v422_v22, %v210_v25  ;;  %v220_v28 = vmax.f32 %v216_v24, 0.0 }
 0x191   :  { %v219_v27 = vmax.f32 %v211_v26, 0.0 }
 0x193   :  { %480 = vmatprep.mubr.msk.f32.mxu0 %vm137_vm1, %v219_v27 }
 0x194   :  { %481 = vmatmul.mubr.msk.f32.vlgmr.msra.gmra.mxu0 %vm137_vm1, %v220_v28 }
 0x254   :  { %v482_v34 = vpop.f32.mrf.mxu0 }
 0x255   :  { %v310_v35 = vadd.f32 %v482_v34, %v425_v33 }
 0x256   :  { %v304_v36 = vpop.f32.mrf.mxu0 }
 0x257   :  { %v305_v37 = vadd.f32 %v425_v33, %v304_v36  ;;  %v314_v39 = vmax.f32 %v310_v35, 0.0 }
 0x259   :  { %v313_v38 = vmax.f32 %v305_v37, 0.0 }
 0x25b   :  { %499 = vmatprep.mubr.msk.f32.mxu1 %vm330_vm2, %v313_v38 }
 0x25c   :  { %500 = vmatmul.mubr.msk.f32.vlgmr.msra.gmra.mxu1 %vm330_vm2, %v314_v39 }
 0x31c   :  { %v501_v41 = vpop.f32.mrf.mxu1 }
 0x31d   :  { %v409_v42 = vadd.f32 %v501_v41, %v428_v40 }
 0x31e   :  { %v403_v43 = vpop.f32.mrf.mxu1 }
 0x31f   :  { %414 = vst.msk [vmem:[%s640_s9 + $0x8] sm:$0xff] %vm412_vm3, %v409_v42  ;;  %v404_v44 = vadd.f32 %v428_v40, %v403_v43 }
 0x321   :  { %413 = vst.msk [vmem:[%s640_s9] sm:$0xff] %vm412_vm3, %v404_v44 }

</bundles_post_ra>
